<compile_context>
chip_gen: v7x
topology: tpu7x:2x2x1
jax: 0.10.0
libtpu: 0.0.40
codegen_flags: <defaults>
</compile_context>

<pallas_src>
import math

import jax
import jax.numpy as jnp
from jax.experimental import pallas as pl
from jax.experimental.pallas import tpu as pltpu

_VMEM_INPUT_BUDGET = 24 * 1024 * 1024  # bytes for the double-buffered input block


def _make_kernel(C_total, H, W, B, n_c_steps, out_dtype):
    """Build the fused max/mean + 3x3 conv + sigmoid kernel.

    Block layouts seen by the kernel:
      x_ref              : (B, TC, HW)  input channels tile (native dtype)
      w_ref              : (18,)        conv weights in SMEM, [in][ky][kx], in0 = max map
      o_ref              : (B, 1, HW)   sigmoid(conv) output
      cmax_ref/csum_ref  : (B, 1, HW)   running channel max / sum (only if n_c_steps > 1)
    """
    HW = H * W
    inv_c = 1.0 / float(C_total)

    def _border_masks():
        # flat (row-major) pixel index -> which 3x3 neighbours exist (zero pad)
        jj = jax.lax.broadcasted_iota(jnp.int32, (1, HW), 1)
        col = jj % W
        return (col > 0,                # (y, x-1) exists
                col < (W - 1),          # (y, x+1) exists
                jj >= W,                # (y-1, x) exists
                jj < (H - 1) * W)       # (y+1, x) exists

    def _conv_sigmoid(cmax, cmean, w_ref, masks):
        """3x3 conv (2->1 ch, pad=1, no bias) + sigmoid on flat (1, HW) maps."""
        m_l, m_r, m_t, m_b = masks

        def roll(v, s):                                   # always non-negative shift
            return pltpu.roll(v, s % HW, axis=1)

        def hshift(m):
            return (jnp.where(m_l, roll(m, 1), 0.0),      # value at (y, x-1)
                    m,                                    # value at (y, x  )
                    jnp.where(m_r, roll(m, -1), 0.0))     # value at (y, x+1)

        taps = hshift(cmax) + hshift(cmean)               # maxL,maxC,maxR,meanL,meanC,meanR

        def wgt(i, ky, kx):                               # torch OIHW (1,2,3,3) flattened
            return w_ref[i * 9 + ky * 3 + kx]

        def hrow(ky):                                     # horizontal 3-tap combo, kernel row ky
            return (wgt(0, ky, 0) * taps[0] + wgt(0, ky, 1) * taps[1] + wgt(0, ky, 2) * taps[2]
                    + wgt(1, ky, 0) * taps[3] + wgt(1, ky, 1) * taps[4] + wgt(1, ky, 2) * taps[5])

        acc = hrow(1)
        acc = acc + jnp.where(m_t, roll(hrow(0), W), 0.0)     # contribution from row above
        acc = acc + jnp.where(m_b, roll(hrow(2), -W), 0.0)    # contribution from row below
        return jax.nn.sigmoid(acc).astype(out_dtype)

    if n_c_steps == 1:
        # Single channel tile: no accumulator scratch, no pl.when phases.
        def kernel(x_ref, w_ref, o_ref):
            masks = _border_masks()
            for b in range(B):                                # bounded unroll, B <= 8
                xb = x_ref[b].astype(jnp.float32)             # (C, HW)
                cmax = jnp.max(xb, axis=0, keepdims=True)     # (1, HW)
                cmean = jnp.sum(xb, axis=0, keepdims=True) * inv_c
                o_ref[b] = _conv_sigmoid(cmax, cmean, w_ref, masks)

        return kernel

    # Channel-tiled path: running max / sum accumulated across the trailing
    # "arbitrary" grid axis; conv + sigmoid + store only on the last tile.
    def kernel(x_ref, w_ref, o_ref, cmax_ref, csum_ref):
        c = pl.program_id(1)

        @pl.when(c == 0)
        def _():
            for b in range(B):
                xb = x_ref[b].astype(jnp.float32)
                cmax_ref[b] = jnp.max(xb, axis=0, keepdims=True)
                csum_ref[b] = jnp.sum(xb, axis=0, keepdims=True)

        @pl.when(c > 0)
        def _():
            for b in range(B):
                xb = x_ref[b].astype(jnp.float32)
                cmax_ref[b] = jnp.maximum(cmax_ref[b], jnp.max(xb, axis=0, keepdims=True))
                csum_ref[b] = csum_ref[b] + jnp.sum(xb, axis=0, keepdims=True)

        @pl.when(c == n_c_steps - 1)
        def _():
            masks = _border_masks()
            for b in range(B):
                o_ref[b] = _conv_sigmoid(cmax_ref[b], csum_ref[b] * inv_c, w_ref, masks)

    return kernel


def _pick_tiles(N, C, HW, in_itemsize):
    """Pick (images per step, channels per step) under a VMEM budget."""
    # Images per grid step: largest divisor of N that is <= 8 (no partial blocks,
    # bounded in-kernel unroll, amortizes per-step overhead on single-TC chips).
    B = 1
    for d in range(min(N, 8), 0, -1):
        if N % d == 0:
            B = d
            break
    # Channel tile: full C if the double-buffered input block fits the budget,
    # otherwise the largest multiple-of-8 divisor of C that does.
    if 2 * B * C * HW * in_itemsize <= _VMEM_INPUT_BUDGET or C <= 8:
        TC = C
    else:
        TC = C
        cand = (_VMEM_INPUT_BUDGET // (2 * B * HW * in_itemsize) // 8) * 8
        while cand >= 8:
            if C % cand == 0:
                TC = cand
                break
            cand -= 8
    return B, TC


@jax.jit
def spatial_attention_forward(x_nchw, w_conv):
    """x_nchw: (N, C, H, W) float; w_conv: (1, 2, 3, 3) torch-OIHW conv weight.
    Returns (N, 1, H, W), matching SpatialAttentionModule.forward."""
    N, C, H, W = x_nchw.shape
    HW = H * W
    in_dtype = x_nchw.dtype
    out_dtype = in_dtype

    x_flat = x_nchw.reshape(N, C, HW)                    # free reshape (contiguous)
    w_flat = w_conv.astype(jnp.float32).reshape(-1)      # (18,) = [in][ky][kx]

    B, TC = _pick_tiles(N, C, HW, in_dtype.itemsize)
    n_b = N // B
    n_c = C // TC

    kernel = _make_kernel(C, H, W, B, n_c, out_dtype)

    scratch = ([] if n_c == 1 else
               [pltpu.VMEM((B, 1, HW), jnp.float32),
                pltpu.VMEM((B, 1, HW), jnp.float32)])

    est_vmem = (2 * B * TC * HW * in_dtype.itemsize                 # double-buffered input
                + 2 * B * HW * jnp.dtype(out_dtype).itemsize        # double-buffered output
                + (0 if n_c == 1 else 2 * B * HW * 4))              # accumulators
    vmem_limit = int(min(64 * 1024 * 1024, max(8 * 1024 * 1024, 2 * est_vmem)))

    out = pl.pallas_call(
        kernel,
        out_shape=jax.ShapeDtypeStruct((N, 1, HW), out_dtype),
        grid=(n_b, n_c),
        in_specs=[
            pl.BlockSpec((B, TC, HW), lambda n, c: (n, c, 0)),
            # 18 conv weights live in SMEM and are read as scalars
            pl.BlockSpec(memory_space=pltpu.MemorySpace.SMEM),
        ],
        out_specs=pl.BlockSpec((B, 1, HW), lambda n, c: (n, 0, 0)),
        scratch_shapes=scratch,
        compiler_params=pltpu.CompilerParams(
            dimension_semantics=("parallel", "arbitrary"),
            vmem_limit_bytes=vmem_limit),
    )(x_flat, w_flat)

    return out.reshape(N, 1, H, W)


def _reference(x, w):
    """Pure-JAX reference with the exact torch semantics."""
    x1 = jnp.max(x, axis=1, keepdims=True)
    x2 = jnp.mean(x, axis=1, keepdims=True)
    xc = jnp.concatenate([x1, x2], axis=1)
    y = jax.lax.conv_general_dilated(
        xc, w, window_strides=(1, 1), padding=((1, 1), (1, 1)),
        dimension_numbers=("NCHW", "OIHW", "NCHW"),
        precision=jax.lax.Precision.HIGHEST)
    return jax.nn.sigmoid(y)


if __name__ == "__main__":
    key = jax.random.PRNGKey(0)
    kx, kw = jax.random.split(key)

    N, C, H, W = 2, 4, 16, 16
    x = jax.random.normal(kx, (N, C, H, W), dtype=jnp.float32)
    # Conv2d(2, 1, 3) with kaiming_normal_(mode='fan_in', nonlinearity='relu'):
    # std = sqrt(2 / fan_in) = sqrt(2 / (2*3*3)); bias=False in conv3x3.
    w = jax.random.normal(kw, (1, 2, 3, 3), dtype=jnp.float32) * math.sqrt(2.0 / 18.0)

    out = jax.block_until_ready(spatial_attention_forward(x, w))
    assert out.shape == (N, 1, H, W), out.shape

    ref = jax.block_until_ready(_reference(x, w))
    max_err = float(jnp.max(jnp.abs(out - ref)))
    assert jnp.allclose(out, ref, atol=1e-5, rtol=1e-5), max_err

    print("KERNEL_OK")
</pallas_src>

<mosaic_0001>
module attributes {stable_mosaic.version = 11 : i64} {
  func.func @kernel(%arg0: i32, %arg1: i32, %arg2: memref<2x4x256xf32, #tpu.memory_space<vmem>>, %arg3: memref<18xf32, #tpu.memory_space<smem>>, %arg4: memref<2x1x256xf32, #tpu.memory_space<vmem>>) attributes {dimension_semantics = [#tpu.dimension_semantics<parallel>, #tpu.dimension_semantics<arbitrary>], iteration_bounds = array<i64: 1, 1>, scalar_prefetch = 0 : i64, scratch_operands = 0 : i64, tpu.core_type = #tpu.core_type<tc>, window_params = [{transform_indices = @transform_0, window_bounds = array<i64: 2, 4, 256>}, {transform_indices = @transform_1, window_bounds = array<i64: 18>}, {transform_indices = @transform_2, window_bounds = array<i64: 2, 1, 256>}]} {
    %0 = tpu.iota {dimensions = array<i32: 1>} : vector<1x256xi32>
    %c16_i32 = arith.constant 16 : i32
    %c0_i32 = arith.constant 0 : i32
    %1 = arith.cmpi eq, %c16_i32, %c0_i32 : i32
    %c1_i32 = arith.constant 1 : i32
    %2 = arith.select %1, %c1_i32, %c16_i32 : i32
    %3 = vector.broadcast %2 : i32 to vector<1x256xi32>
    %4 = arith.remsi %0, %3 : vector<1x256xi32>
    %c0_i32_0 = arith.constant 0 : i32
    %5 = vector.broadcast %c0_i32_0 : i32 to vector<1x256xi32>
    %6 = arith.cmpi ne, %4, %5 : vector<1x256xi32>
    %c0_i32_1 = arith.constant 0 : i32
    %7 = vector.broadcast %c0_i32_1 : i32 to vector<1x256xi32>
    %8 = arith.cmpi slt, %4, %7 : vector<1x256xi32>
    %c0_i32_2 = arith.constant 0 : i32
    %9 = arith.cmpi slt, %2, %c0_i32_2 : i32
    %10 = vector.broadcast %9 : i1 to vector<1x256xi1>
    %11 = vector.broadcast %10 : vector<1x256xi1> to vector<1x256xi1>
    %12 = arith.xori %8, %11 : vector<1x256xi1>
    %13 = arith.andi %12, %6 : vector<1x256xi1>
    %14 = vector.broadcast %2 : i32 to vector<1x256xi32>
    %15 = arith.addi %4, %14 : vector<1x256xi32>
    %16 = arith.select %13, %15, %4 : vector<1x256xi1>, vector<1x256xi32>
    %c0_i32_3 = arith.constant 0 : i32
    %17 = vector.broadcast %c0_i32_3 : i32 to vector<1x256xi32>
    %18 = arith.cmpi sgt, %16, %17 : vector<1x256xi32>
    %c15_i32 = arith.constant 15 : i32
    %19 = vector.broadcast %c15_i32 : i32 to vector<1x256xi32>
    %20 = arith.cmpi slt, %16, %19 : vector<1x256xi32>
    %c16_i32_4 = arith.constant 16 : i32
    %21 = vector.broadcast %c16_i32_4 : i32 to vector<1x256xi32>
    %22 = arith.cmpi sge, %0, %21 : vector<1x256xi32>
    %c240_i32 = arith.constant 240 : i32
    %23 = vector.broadcast %c240_i32 : i32 to vector<1x256xi32>
    %24 = arith.cmpi slt, %0, %23 : vector<1x256xi32>
    %c0 = arith.constant 0 : index
    %c0_5 = arith.constant 0 : index
    %c0_6 = arith.constant 0 : index
    %25 = vector.load %arg2[%c0, %c0_5, %c0_6] : memref<2x4x256xf32, #tpu.memory_space<vmem>>, vector<1x4x256xf32>
    %26 = vector.shape_cast %25 : vector<1x4x256xf32> to vector<4x256xf32>
    %cst = arith.constant dense<0xFF800000> : vector<256xf32>
    %27 = vector.multi_reduction <maximumf>, %26, %cst [0] : vector<4x256xf32> to vector<256xf32>
    %28 = vector.shape_cast %27 : vector<256xf32> to vector<1x256xf32>
    %cst_7 = arith.constant dense<0.000000e+00> : vector<256xf32>
    %29 = vector.multi_reduction <add>, %26, %cst_7 [0] : vector<4x256xf32> to vector<256xf32>
    %30 = vector.shape_cast %29 : vector<256xf32> to vector<1x256xf32>
    %cst_8 = arith.constant 2.500000e-01 : f32
    %31 = vector.broadcast %cst_8 : f32 to vector<1x256xf32>
    %32 = arith.mulf %30, %31 : vector<1x256xf32>
    %c1_i32_9 = arith.constant 1 : i32
    %33 = tpu.dynamic_rotate %28 by %c1_i32_9 dim 1 : vector<1x256xf32>, i32 -> vector<1x256xf32>
    %cst_10 = arith.constant 0.000000e+00 : f32
    %34 = vector.broadcast %cst_10 : f32 to vector<1x256xf32>
    %35 = arith.select %18, %33, %34 : vector<1x256xi1>, vector<1x256xf32>
    %c255_i32 = arith.constant 255 : i32
    %36 = tpu.dynamic_rotate %28 by %c255_i32 dim 1 : vector<1x256xf32>, i32 -> vector<1x256xf32>
    %cst_11 = arith.constant 0.000000e+00 : f32
    %37 = vector.broadcast %cst_11 : f32 to vector<1x256xf32>
    %38 = arith.select %20, %36, %37 : vector<1x256xi1>, vector<1x256xf32>
    %c1_i32_12 = arith.constant 1 : i32
    %39 = tpu.dynamic_rotate %32 by %c1_i32_12 dim 1 : vector<1x256xf32>, i32 -> vector<1x256xf32>
    %cst_13 = arith.constant 0.000000e+00 : f32
    %40 = vector.broadcast %cst_13 : f32 to vector<1x256xf32>
    %41 = arith.select %18, %39, %40 : vector<1x256xi1>, vector<1x256xf32>
    %c255_i32_14 = arith.constant 255 : i32
    %42 = tpu.dynamic_rotate %32 by %c255_i32_14 dim 1 : vector<1x256xf32>, i32 -> vector<1x256xf32>
    %cst_15 = arith.constant 0.000000e+00 : f32
    %43 = vector.broadcast %cst_15 : f32 to vector<1x256xf32>
    %44 = arith.select %20, %42, %43 : vector<1x256xi1>, vector<1x256xf32>
    %c3 = arith.constant 3 : index
    %45 = memref.load %arg3[%c3] : memref<18xf32, #tpu.memory_space<smem>>
    %46 = vector.broadcast %45 : f32 to vector<1x256xf32>
    %47 = arith.mulf %46, %35 : vector<1x256xf32>
    %c4 = arith.constant 4 : index
    %48 = memref.load %arg3[%c4] : memref<18xf32, #tpu.memory_space<smem>>
    %49 = vector.broadcast %48 : f32 to vector<1x256xf32>
    %50 = arith.mulf %49, %28 : vector<1x256xf32>
    %51 = arith.addf %47, %50 : vector<1x256xf32>
    %c5 = arith.constant 5 : index
    %52 = memref.load %arg3[%c5] : memref<18xf32, #tpu.memory_space<smem>>
    %53 = vector.broadcast %52 : f32 to vector<1x256xf32>
    %54 = arith.mulf %53, %38 : vector<1x256xf32>
    %55 = arith.addf %51, %54 : vector<1x256xf32>
    %c12 = arith.constant 12 : index
    %56 = memref.load %arg3[%c12] : memref<18xf32, #tpu.memory_space<smem>>
    %57 = vector.broadcast %56 : f32 to vector<1x256xf32>
    %58 = arith.mulf %57, %41 : vector<1x256xf32>
    %59 = arith.addf %55, %58 : vector<1x256xf32>
    %c13 = arith.constant 13 : index
    %60 = memref.load %arg3[%c13] : memref<18xf32, #tpu.memory_space<smem>>
    %61 = vector.broadcast %60 : f32 to vector<1x256xf32>
    %62 = arith.mulf %61, %32 : vector<1x256xf32>
    %63 = arith.addf %59, %62 : vector<1x256xf32>
    %c14 = arith.constant 14 : index
    %64 = memref.load %arg3[%c14] : memref<18xf32, #tpu.memory_space<smem>>
    %65 = vector.broadcast %64 : f32 to vector<1x256xf32>
    %66 = arith.mulf %65, %44 : vector<1x256xf32>
    %67 = arith.addf %63, %66 : vector<1x256xf32>
    %c0_16 = arith.constant 0 : index
    %68 = memref.load %arg3[%c0_16] : memref<18xf32, #tpu.memory_space<smem>>
    %69 = vector.broadcast %68 : f32 to vector<1x256xf32>
    %70 = arith.mulf %69, %35 : vector<1x256xf32>
    %c1 = arith.constant 1 : index
    %71 = memref.load %arg3[%c1] : memref<18xf32, #tpu.memory_space<smem>>
    %72 = vector.broadcast %71 : f32 to vector<1x256xf32>
    %73 = arith.mulf %72, %28 : vector<1x256xf32>
    %74 = arith.addf %70, %73 : vector<1x256xf32>
    %c2 = arith.constant 2 : index
    %75 = memref.load %arg3[%c2] : memref<18xf32, #tpu.memory_space<smem>>
    %76 = vector.broadcast %75 : f32 to vector<1x256xf32>
    %77 = arith.mulf %76, %38 : vector<1x256xf32>
    %78 = arith.addf %74, %77 : vector<1x256xf32>
    %c9 = arith.constant 9 : index
    %79 = memref.load %arg3[%c9] : memref<18xf32, #tpu.memory_space<smem>>
    %80 = vector.broadcast %79 : f32 to vector<1x256xf32>
    %81 = arith.mulf %80, %41 : vector<1x256xf32>
    %82 = arith.addf %78, %81 : vector<1x256xf32>
    %c10 = arith.constant 10 : index
    %83 = memref.load %arg3[%c10] : memref<18xf32, #tpu.memory_space<smem>>
    %84 = vector.broadcast %83 : f32 to vector<1x256xf32>
    %85 = arith.mulf %84, %32 : vector<1x256xf32>
    %86 = arith.addf %82, %85 : vector<1x256xf32>
    %c11 = arith.constant 11 : index
    %87 = memref.load %arg3[%c11] : memref<18xf32, #tpu.memory_space<smem>>
    %88 = vector.broadcast %87 : f32 to vector<1x256xf32>
    %89 = arith.mulf %88, %44 : vector<1x256xf32>
    %90 = arith.addf %86, %89 : vector<1x256xf32>
    %c16_i32_17 = arith.constant 16 : i32
    %91 = tpu.dynamic_rotate %90 by %c16_i32_17 dim 1 : vector<1x256xf32>, i32 -> vector<1x256xf32>
    %cst_18 = arith.constant 0.000000e+00 : f32
    %92 = vector.broadcast %cst_18 : f32 to vector<1x256xf32>
    %93 = arith.select %22, %91, %92 : vector<1x256xi1>, vector<1x256xf32>
    %94 = arith.addf %67, %93 : vector<1x256xf32>
    %c6 = arith.constant 6 : index
    %95 = memref.load %arg3[%c6] : memref<18xf32, #tpu.memory_space<smem>>
    %96 = vector.broadcast %95 : f32 to vector<1x256xf32>
    %97 = arith.mulf %96, %35 : vector<1x256xf32>
    %c7 = arith.constant 7 : index
    %98 = memref.load %arg3[%c7] : memref<18xf32, #tpu.memory_space<smem>>
    %99 = vector.broadcast %98 : f32 to vector<1x256xf32>
    %100 = arith.mulf %99, %28 : vector<1x256xf32>
    %101 = arith.addf %97, %100 : vector<1x256xf32>
    %c8 = arith.constant 8 : index
    %102 = memref.load %arg3[%c8] : memref<18xf32, #tpu.memory_space<smem>>
    %103 = vector.broadcast %102 : f32 to vector<1x256xf32>
    %104 = arith.mulf %103, %38 : vector<1x256xf32>
    %105 = arith.addf %101, %104 : vector<1x256xf32>
    %c15 = arith.constant 15 : index
    %106 = memref.load %arg3[%c15] : memref<18xf32, #tpu.memory_space<smem>>
    %107 = vector.broadcast %106 : f32 to vector<1x256xf32>
    %108 = arith.mulf %107, %41 : vector<1x256xf32>
    %109 = arith.addf %105, %108 : vector<1x256xf32>
    %c16 = arith.constant 16 : index
    %110 = memref.load %arg3[%c16] : memref<18xf32, #tpu.memory_space<smem>>
    %111 = vector.broadcast %110 : f32 to vector<1x256xf32>
    %112 = arith.mulf %111, %32 : vector<1x256xf32>
    %113 = arith.addf %109, %112 : vector<1x256xf32>
    %c17 = arith.constant 17 : index
    %114 = memref.load %arg3[%c17] : memref<18xf32, #tpu.memory_space<smem>>
    %115 = vector.broadcast %114 : f32 to vector<1x256xf32>
    %116 = arith.mulf %115, %44 : vector<1x256xf32>
    %117 = arith.addf %113, %116 : vector<1x256xf32>
    %c240_i32_19 = arith.constant 240 : i32
    %118 = tpu.dynamic_rotate %117 by %c240_i32_19 dim 1 : vector<1x256xf32>, i32 -> vector<1x256xf32>
    %cst_20 = arith.constant 0.000000e+00 : f32
    %119 = vector.broadcast %cst_20 : f32 to vector<1x256xf32>
    %120 = arith.select %24, %118, %119 : vector<1x256xi1>, vector<1x256xf32>
    %121 = arith.addf %94, %120 : vector<1x256xf32>
    %122 = arith.negf %121 : vector<1x256xf32>
    %123 = math.exp %122 : vector<1x256xf32>
    %cst_21 = arith.constant 1.000000e+00 : f32
    %124 = vector.broadcast %cst_21 : f32 to vector<1x256xf32>
    %125 = arith.addf %124, %123 : vector<1x256xf32>
    %126 = arith.divf %124, %125 : vector<1x256xf32>
    %c0_22 = arith.constant 0 : index
    %c0_23 = arith.constant 0 : index
    %c0_24 = arith.constant 0 : index
    %127 = vector.load %arg4[%c0_22, %c0_23, %c0_24] : memref<2x1x256xf32, #tpu.memory_space<vmem>>, vector<1x1x256xf32>
    %128 = vector.shape_cast %127 : vector<1x1x256xf32> to vector<1x256xf32>
    %129 = vector.shape_cast %126 : vector<1x256xf32> to vector<1x1x256xf32>
    tpu.vector_store %arg4[%c0_22, %c0_23, %c0_24], %129 {strides = array<i32>} : memref<2x1x256xf32, #tpu.memory_space<vmem>>, vector<1x1x256xf32>,
    %c1_25 = arith.constant 1 : index
    %c0_26 = arith.constant 0 : index
    %c0_27 = arith.constant 0 : index
    %130 = vector.load %arg2[%c1_25, %c0_26, %c0_27] : memref<2x4x256xf32, #tpu.memory_space<vmem>>, vector<1x4x256xf32>
    %131 = vector.shape_cast %130 : vector<1x4x256xf32> to vector<4x256xf32>
    %cst_28 = arith.constant dense<0xFF800000> : vector<256xf32>
    %132 = vector.multi_reduction <maximumf>, %131, %cst_28 [0] : vector<4x256xf32> to vector<256xf32>
    %133 = vector.shape_cast %132 : vector<256xf32> to vector<1x256xf32>
    %cst_29 = arith.constant dense<0.000000e+00> : vector<256xf32>
    %134 = vector.multi_reduction <add>, %131, %cst_29 [0] : vector<4x256xf32> to vector<256xf32>
    %135 = vector.shape_cast %134 : vector<256xf32> to vector<1x256xf32>
    %cst_30 = arith.constant 2.500000e-01 : f32
    %136 = vector.broadcast %cst_30 : f32 to vector<1x256xf32>
    %137 = arith.mulf %135, %136 : vector<1x256xf32>
    %c1_i32_31 = arith.constant 1 : i32
    %138 = tpu.dynamic_rotate %133 by %c1_i32_31 dim 1 : vector<1x256xf32>, i32 -> vector<1x256xf32>
    %cst_32 = arith.constant 0.000000e+00 : f32
    %139 = vector.broadcast %cst_32 : f32 to vector<1x256xf32>
    %140 = arith.select %18, %138, %139 : vector<1x256xi1>, vector<1x256xf32>
    %c255_i32_33 = arith.constant 255 : i32
    %141 = tpu.dynamic_rotate %133 by %c255_i32_33 dim 1 : vector<1x256xf32>, i32 -> vector<1x256xf32>
    %cst_34 = arith.constant 0.000000e+00 : f32
    %142 = vector.broadcast %cst_34 : f32 to vector<1x256xf32>
    %143 = arith.select %20, %141, %142 : vector<1x256xi1>, vector<1x256xf32>
    %c1_i32_35 = arith.constant 1 : i32
    %144 = tpu.dynamic_rotate %137 by %c1_i32_35 dim 1 : vector<1x256xf32>, i32 -> vector<1x256xf32>
    %cst_36 = arith.constant 0.000000e+00 : f32
    %145 = vector.broadcast %cst_36 : f32 to vector<1x256xf32>
    %146 = arith.select %18, %144, %145 : vector<1x256xi1>, vector<1x256xf32>
    %c255_i32_37 = arith.constant 255 : i32
    %147 = tpu.dynamic_rotate %137 by %c255_i32_37 dim 1 : vector<1x256xf32>, i32 -> vector<1x256xf32>
    %cst_38 = arith.constant 0.000000e+00 : f32
    %148 = vector.broadcast %cst_38 : f32 to vector<1x256xf32>
    %149 = arith.select %20, %147, %148 : vector<1x256xi1>, vector<1x256xf32>
    %c3_39 = arith.constant 3 : index
    %150 = memref.load %arg3[%c3_39] : memref<18xf32, #tpu.memory_space<smem>>
    %151 = vector.broadcast %150 : f32 to vector<1x256xf32>
    %152 = arith.mulf %151, %140 : vector<1x256xf32>
    %c4_40 = arith.constant 4 : index
    %153 = memref.load %arg3[%c4_40] : memref<18xf32, #tpu.memory_space<smem>>
    %154 = vector.broadcast %153 : f32 to vector<1x256xf32>
    %155 = arith.mulf %154, %133 : vector<1x256xf32>
    %156 = arith.addf %152, %155 : vector<1x256xf32>
    %c5_41 = arith.constant 5 : index
    %157 = memref.load %arg3[%c5_41] : memref<18xf32, #tpu.memory_space<smem>>
    %158 = vector.broadcast %157 : f32 to vector<1x256xf32>
    %159 = arith.mulf %158, %143 : vector<1x256xf32>
    %160 = arith.addf %156, %159 : vector<1x256xf32>
    %c12_42 = arith.constant 12 : index
    %161 = memref.load %arg3[%c12_42] : memref<18xf32, #tpu.memory_space<smem>>
    %162 = vector.broadcast %161 : f32 to vector<1x256xf32>
    %163 = arith.mulf %162, %146 : vector<1x256xf32>
    %164 = arith.addf %160, %163 : vector<1x256xf32>
    %c13_43 = arith.constant 13 : index
    %165 = memref.load %arg3[%c13_43] : memref<18xf32, #tpu.memory_space<smem>>
    %166 = vector.broadcast %165 : f32 to vector<1x256xf32>
    %167 = arith.mulf %166, %137 : vector<1x256xf32>
    %168 = arith.addf %164, %167 : vector<1x256xf32>
    %c14_44 = arith.constant 14 : index
    %169 = memref.load %arg3[%c14_44] : memref<18xf32, #tpu.memory_space<smem>>
    %170 = vector.broadcast %169 : f32 to vector<1x256xf32>
    %171 = arith.mulf %170, %149 : vector<1x256xf32>
    %172 = arith.addf %168, %171 : vector<1x256xf32>
    %c0_45 = arith.constant 0 : index
    %173 = memref.load %arg3[%c0_45] : memref<18xf32, #tpu.memory_space<smem>>
    %174 = vector.broadcast %173 : f32 to vector<1x256xf32>
    %175 = arith.mulf %174, %140 : vector<1x256xf32>
    %c1_46 = arith.constant 1 : index
    %176 = memref.load %arg3[%c1_46] : memref<18xf32, #tpu.memory_space<smem>>
    %177 = vector.broadcast %176 : f32 to vector<1x256xf32>
    %178 = arith.mulf %177, %133 : vector<1x256xf32>
    %179 = arith.addf %175, %178 : vector<1x256xf32>
    %c2_47 = arith.constant 2 : index
    %180 = memref.load %arg3[%c2_47] : memref<18xf32, #tpu.memory_space<smem>>
    %181 = vector.broadcast %180 : f32 to vector<1x256xf32>
    %182 = arith.mulf %181, %143 : vector<1x256xf32>
    %183 = arith.addf %179, %182 : vector<1x256xf32>
    %c9_48 = arith.constant 9 : index
    %184 = memref.load %arg3[%c9_48] : memref<18xf32, #tpu.memory_space<smem>>
    %185 = vector.broadcast %184 : f32 to vector<1x256xf32>
    %186 = arith.mulf %185, %146 : vector<1x256xf32>
    %187 = arith.addf %183, %186 : vector<1x256xf32>
    %c10_49 = arith.constant 10 : index
    %188 = memref.load %arg3[%c10_49] : memref<18xf32, #tpu.memory_space<smem>>
    %189 = vector.broadcast %188 : f32 to vector<1x256xf32>
    %190 = arith.mulf %189, %137 : vector<1x256xf32>
    %191 = arith.addf %187, %190 : vector<1x256xf32>
    %c11_50 = arith.constant 11 : index
    %192 = memref.load %arg3[%c11_50] : memref<18xf32, #tpu.memory_space<smem>>
    %193 = vector.broadcast %192 : f32 to vector<1x256xf32>
    %194 = arith.mulf %193, %149 : vector<1x256xf32>
    %195 = arith.addf %191, %194 : vector<1x256xf32>
    %c16_i32_51 = arith.constant 16 : i32
    %196 = tpu.dynamic_rotate %195 by %c16_i32_51 dim 1 : vector<1x256xf32>, i32 -> vector<1x256xf32>
    %cst_52 = arith.constant 0.000000e+00 : f32
    %197 = vector.broadcast %cst_52 : f32 to vector<1x256xf32>
    %198 = arith.select %22, %196, %197 : vector<1x256xi1>, vector<1x256xf32>
    %199 = arith.addf %172, %198 : vector<1x256xf32>
    %c6_53 = arith.constant 6 : index
    %200 = memref.load %arg3[%c6_53] : memref<18xf32, #tpu.memory_space<smem>>
    %201 = vector.broadcast %200 : f32 to vector<1x256xf32>
    %202 = arith.mulf %201, %140 : vector<1x256xf32>
    %c7_54 = arith.constant 7 : index
    %203 = memref.load %arg3[%c7_54] : memref<18xf32, #tpu.memory_space<smem>>
    %204 = vector.broadcast %203 : f32 to vector<1x256xf32>
    %205 = arith.mulf %204, %133 : vector<1x256xf32>
    %206 = arith.addf %202, %205 : vector<1x256xf32>
    %c8_55 = arith.constant 8 : index
    %207 = memref.load %arg3[%c8_55] : memref<18xf32, #tpu.memory_space<smem>>
    %208 = vector.broadcast %207 : f32 to vector<1x256xf32>
    %209 = arith.mulf %208, %143 : vector<1x256xf32>
    %210 = arith.addf %206, %209 : vector<1x256xf32>
    %c15_56 = arith.constant 15 : index
    %211 = memref.load %arg3[%c15_56] : memref<18xf32, #tpu.memory_space<smem>>
    %212 = vector.broadcast %211 : f32 to vector<1x256xf32>
    %213 = arith.mulf %212, %146 : vector<1x256xf32>
    %214 = arith.addf %210, %213 : vector<1x256xf32>
    %c16_57 = arith.constant 16 : index
    %215 = memref.load %arg3[%c16_57] : memref<18xf32, #tpu.memory_space<smem>>
    %216 = vector.broadcast %215 : f32 to vector<1x256xf32>
    %217 = arith.mulf %216, %137 : vector<1x256xf32>
    %218 = arith.addf %214, %217 : vector<1x256xf32>
    %c17_58 = arith.constant 17 : index
    %219 = memref.load %arg3[%c17_58] : memref<18xf32, #tpu.memory_space<smem>>
    %220 = vector.broadcast %219 : f32 to vector<1x256xf32>
    %221 = arith.mulf %220, %149 : vector<1x256xf32>
    %222 = arith.addf %218, %221 : vector<1x256xf32>
    %c240_i32_59 = arith.constant 240 : i32
    %223 = tpu.dynamic_rotate %222 by %c240_i32_59 dim 1 : vector<1x256xf32>, i32 -> vector<1x256xf32>
    %cst_60 = arith.constant 0.000000e+00 : f32
    %224 = vector.broadcast %cst_60 : f32 to vector<1x256xf32>
    %225 = arith.select %24, %223, %224 : vector<1x256xi1>, vector<1x256xf32>
    %226 = arith.addf %199, %225 : vector<1x256xf32>
    %227 = arith.negf %226 : vector<1x256xf32>
    %228 = math.exp %227 : vector<1x256xf32>
    %cst_61 = arith.constant 1.000000e+00 : f32
    %229 = vector.broadcast %cst_61 : f32 to vector<1x256xf32>
    %230 = arith.addf %229, %228 : vector<1x256xf32>
    %231 = arith.divf %229, %230 : vector<1x256xf32>
    %c1_62 = arith.constant 1 : index
    %c0_63 = arith.constant 0 : index
    %c0_64 = arith.constant 0 : index
    %232 = vector.load %arg4[%c1_62, %c0_63, %c0_64] : memref<2x1x256xf32, #tpu.memory_space<vmem>>, vector<1x1x256xf32>
    %233 = vector.shape_cast %232 : vector<1x1x256xf32> to vector<1x256xf32>
    %234 = vector.shape_cast %231 : vector<1x256xf32> to vector<1x1x256xf32>
    tpu.vector_store %arg4[%c1_62, %c0_63, %c0_64], %234 {strides = array<i32>} : memref<2x1x256xf32, #tpu.memory_space<vmem>>, vector<1x1x256xf32>,
    return
  }
  func.func @transform_0(%arg0: i32, %arg1: i32) -> (i32, i32, i32) {
    %c0_i32 = arith.constant 0 : i32
    %c0_i32_0 = arith.constant 0 : i32
    return %arg0, %arg1, %c0_i32 : i32, i32, i32
  }
  func.func @transform_1(%arg0: i32, %arg1: i32) -> i32 {
    %c0_i32 = arith.constant 0 : i32
    %c0_i32_0 = arith.constant 0 : i32
    return %c0_i32 : i32
  }
  func.func @transform_2(%arg0: i32, %arg1: i32) -> (i32, i32, i32) {
    %c0_i32 = arith.constant 0 : i32
    %c0_i32_0 = arith.constant 0 : i32
    %c0_i32_1 = arith.constant 0 : i32
    return %arg0, %c0_i32, %c0_i32_0 : i32, i32, i32
  }
}

</mosaic_0001>

<bundles_post_ra>
// kernel: spatial_attention_forward.1
= control target key start
LH: loop header
LB: loop body
LE: loop exit
PB: predicated region body
PF: predicated region fallthrough
CT: control target
= control target key end

     0   :  { %7 = vsyncpa [#allocation3], 0  ;;  %s974_s0 = inlined_call_operand.vmem [shape: f32[2,4,256], index: 0, kind: input, shape index: {}]   ;;  %s975_s1 = inlined_call_operand.vmem [shape: f32[18], index: 1, kind: input, shape index: {}]   ;;  %s976_s2 = inlined_call_operand.vmem [shape: f32[2,1,256], index: 2, kind: output, shape index: {}]  }
   0x1   :  { %s16_s11 = sshll.u32 %s975_s1, 4  ;;  %s17_s11 = int_to_ptr.vmem [resolvable:$true] %s16_s11 }
   0x2   :  { %s577_s12 = scalar_lea.vmem %s17_s11, 16  ;;  %p582_p1 = scmp.lt.s32.totalorder %s17_s11, %s17_s11 }
   0x3   :  { %p578_p0 = scmp.ne.s32.totalorder %s17_s11, %s577_s12  ;;  %p583_p2 = scmp.lt.s32.totalorder %s577_s12, %s577_s12 }
   0x5   :  { %p584_p3 = por %p583_p2, %p582_p1 }
   0x7   :  { %p585_p4 = pnand %p584_p3, %p578_p0 }
   0x9   :  { %588 = shalt.err (!%p585_p4)
}
   0xa   :  { %s591_s13 = smov [#allocation2]  }
   0xb   :  { %19 = dma.vmem_to_smem %s17_s11, 16, %s591_s13, [#allocation3]  }
   0xc   :  { %589 = dma.done.wait [#allocation3], 16  }
   0xd   :  { %590 = vsyncadd [#allocation3], 4294967280 }
   0xe   :  { %23 = sfence }
   0xf   :  { %vm63_vm0 = vcmask 1043456   ;;  %v532_v0 = vld [vmem:[%s974_s0 + $0x8] sm:$0xff]  ;;  %v59_v1 = vld [vmem:[%s974_s0] sm:$0xff]  ;;  %s592_s0 = smov 1   ;;  %s593_s17 = smov 127  }
  0x10   :  { %v292_v2 = vsel %vm63_vm0, %v532_v0, -inf  ;;  %v64_v3 = vsel %vm63_vm0, %v59_v1, -inf  ;;  %v290_v4 = vcombine.high %v532_v0, %v532_v0  ;;  %v61_v5 = vcombine.high %v59_v1, %v59_v1  ;;  %s534_s18 = sld [smem:[#allocation2 + $0x4]]  ;;  %s539_s19 = sld [smem:[#allocation2 + $0x1]] }
  0x11   :  { %v293_v6 = vrot.slane %v292_v2, 4  ;;  %v65_v7 = vrot.slane %v64_v3, 4  ;;  %v78_v8 = vsel %vm63_vm0, %v59_v1, 0.0  ;;  %v306_v9 = vsel %vm63_vm0, %v532_v0, 0.0  ;;  %s545_s20 = sld [smem:[#allocation2 + $0x7]]  ;;  %s533_s21 = sld [smem:[#allocation2 + $0x3]] }
  0x12   :  { %v299_v10 = vsel %vm63_vm0, %v290_v4, -inf  ;;  %v71_v11 = vsel %vm63_vm0, %v61_v5, -inf  ;;  %v85_v12 = vsel %vm63_vm0, %v61_v5, 0.0  ;;  %v79_v13 = vrot.slane %v78_v8, 4  ;;  %s388_s22 = sld [smem:[#allocation2]]  ;;  %s544_s23 = sld [smem:[#allocation2 + $0x6]] }
  0x13   :  { %v294_v14 = vmax.f32 %v292_v2, %v293_v6  ;;  %v66_v15 = vmax.f32 %v64_v3, %v65_v7  ;;  %v300_v16 = vrot.slane %v299_v10, 4  ;;  %v72_v17 = vrot.slane %v71_v11, 4  ;;  %s515_s24 = sld [smem:[#allocation2 + $0x5]]  ;;  %s520_s25 = sld [smem:[#allocation2 + $0x2]] }
  0x14   :  { %v86_v18 = vrot.slane %v85_v12, 4  ;;  %v80_v19 = vadd.f32 %v79_v13, %v78_v8  ;;  %v313_v20 = vsel %vm63_vm0, %v290_v4, 0.0  ;;  %v307_v21 = vrot.slane %v306_v9, 4  ;;  %s526_s26 = sld [smem:[#allocation2 + $0x8]]  ;;  %s668_s27 = sld [smem:[#allocation2 + $0xa]] }
  0x15   :  { %v295_v22 = vrot.slane %v294_v14, 2  ;;  %v67_v23 = vrot.slane %v66_v15, 2  ;;  %v301_v24 = vmax.f32 %v299_v10, %v300_v16  ;;  %v73_v25 = vmax.f32 %v71_v11, %v72_v17  ;;  %s670_s28 = sld [smem:[#allocation2 + $0xc]]  ;;  %s675_s29 = sld [smem:[#allocation2 + $0x9]] }
  0x16   :  { %v87_v26 = vadd.f32 %v86_v18, %v85_v12  ;;  %v314_v27 = vrot.slane %v313_v20, 4  ;;  %v81_v33 = vrot.slane %v80_v19, 2  ;;  %v308_v35 = vadd.f32 %v307_v21, %v306_v9  ;;  %s677_s30 = sld [smem:[#allocation2 + $0x10]]  ;;  %s681_s3 = sld [smem:[#allocation2 + $0xf]] }
  0x17   :  { %v296_v28 = vmax.f32 %v294_v14, %v295_v22  ;;  %v68_v29 = vmax.f32 %v66_v15, %v67_v23  ;;  %v302_v30 = vrot.slane %v301_v24, 2  ;;  %v74_v31 = vrot.slane %v73_v25, 2  ;;  %s683_s4 = sld [smem:[#allocation2 + $0xe]]  ;;  %s690_s5 = sld [smem:[#allocation2 + $0xb]] }
  0x18   :  { %v88_v32 = vrot.slane %v87_v26, 2  ;;  %v315_v34 = vadd.f32 %v314_v27, %v313_v20  ;;  %v82_v43 = vadd.f32 %v81_v33, %v80_v19  ;;  %v309_v44 = vrot.slane %v308_v35, 2  ;;  %s698_s6 = sld [smem:[#allocation2 + $0xd]]  ;;  %s705_s7 = sld [smem:[#allocation2 + $0x11]] }
  0x19   :  { %v297_v36 = vrot.slane %v296_v28, 1  ;;  %v69_v37 = vrot.slane %v68_v29, 1  ;;  %v303_v38 = vmax.f32 %v301_v24, %v302_v30  ;;  %v75_v39 = vmax.f32 %v73_v25, %v74_v31  ;;  %s594_s8 = smov 16   ;;  %s595_s9 = smov 112  }
  0x1a   :  { %v89_v47 = vadd.f32 %v88_v32, %v87_v26  ;;  %v316_v48 = vrot.slane %v315_v34, 2  ;;  %v83_v49 = vrot.slane %v82_v43, 1  ;;  %v310_v53 = vadd.f32 %v309_v44, %v308_v35 }
  0x1b   :  { %v629_v40 = vmax.f32 %v296_v28, %v297_v36  ;;  %v631_v41 = vmax.f32 %v68_v29, %v69_v37  ;;  %v304_v42 = vrot.slane %v303_v38, 1  ;;  %v76_v46 = vrot.slane %v75_v39, 1 }
  0x1c   :  { %v90_v51 = vrot.slane %v89_v47, 1  ;;  %v317_v52 = vadd.f32 %v316_v48, %v315_v34  ;;  %v84_v55 = vadd.f32 %v83_v49, %v82_v43  ;;  %v311_v57 = vrot.slane %v310_v53, 1 }
  0x1d   :  { %322 = vrot.lane.b32.xlu1 %v629_v40, %s592_s0  ;;  %94 = vrot.lane.b32.xlu0 %v631_v41, %s592_s0  ;;  %v305_v45 = vmax.f32 %v303_v38, %v304_v42  ;;  %v639_v50 = vmax.f32 %v75_v39, %v76_v46  ;;  %v977_v0 = vlaneseq  ;;  %v359_v2 = vstv %s534_s18 }
  0x1e   :  { %v91_v54 = vadd.f32 %v90_v51, %v89_v47  ;;  %v318_v56 = vrot.slane %v317_v52, 1  ;;  %v647_v59 = vmul.f32 0.25, %v84_v55  ;;  %v312_v61 = vadd.f32 %v311_v57, %v310_v53 }
  0x1f   :  { %v666_v1 = vand.u32 127, %v977_v0  ;;  %v393_v3 = vstv %s539_s19  ;;  %v437_v4 = vstv %s545_s20  ;;  %v679_v6 = vstv %s533_s21 }
  0x20   :  { %v645_v58 = vmul.f32 0.25, %v91_v54  ;;  %v319_v60 = vadd.f32 %v318_v56, %v317_v52  ;;  %v655_v63 = vmul.f32 0.25, %v312_v61  ;;  %v361_v7 = vmul.f32 %v359_v2, %v305_v45 }
  0x21   :  { %324 = vrot.lane.b32.xlu1 %v305_v45, %s592_s0  ;;  %103 = vrot.lane.b32.xlu0 %v631_v41, %s593_s17  ;;  %v673_v5 = vadd.s32 128, %v666_v1  ;;  %v685_v8 = vstv %s388_s22  ;;  %v687_v9 = vstv %s544_s23  ;;  %v31_v10 = vand.u32 15, %v666_v1 }
  0x22   :  { %v653_v62 = vmul.f32 0.25, %v319_v60  ;;  %v692_v11 = vmul.f32 %v393_v3, %v305_v45  ;;  %v694_v12 = vmul.f32 %v437_v4, %v305_v45  ;;  %v360_v13 = vmul.f32 %v359_v2, %v629_v40 }
  0x23   :  { %982 = vst [vmem:[#allocation5_spill] sm:$0xff] %v673_v5  ;;  %v394_v14 = vmul.f32 %v393_v3, %v629_v40  ;;  %v38_v15 = vand.u32 15, %v673_v5  ;;  %vm98_vm1 = vcmp.lt.s32.totalorder %v666_v1, 1  ;;  %v438_v16 = vmul.f32 %v437_v4, %v629_v40 }
  0x24   :  { %v703_v17 = vstv %s515_s24  ;;  %v709_v20 = vstv %s520_s25  ;;  %v711_v21 = vstv %s526_s26  ;;  %vm107_vm2 = vcmp.lt.s32.totalorder %v666_v1, 127 }
  0x25   :  { %330 = vrot.lane.b32.xlu0 %v629_v40, %s593_s17  ;;  %105 = vrot.lane.b32.xlu1 %v639_v50, %s593_s17  ;;  %v715_v22 = vmul.f32 %v359_v2, %v631_v41  ;;  %vm717_vm3 = vcmp.gt.s32.totalorder %v31_v10, 0  ;;  %vm721_vm4 = vcmp.lt.s32.totalorder %v31_v10, 15  ;;  %v726_v25 = vmul.f32 %v393_v3, %v631_v41 }
  0x26   :  { %v185_v26 = vstv %s668_s27  ;;  %v730_v27 = vmul.f32 %v437_v4, %v631_v41  ;;  %v733_v28 = vmul.f32 %v359_v2, %v639_v50  ;;  %v736_v29 = vmul.f32 %v393_v3, %v639_v50 }
  0x27   :  { %v739_v30 = vmul.f32 %v437_v4, %v639_v50  ;;  %vm741_vm5 = vcmp.gt.s32.totalorder %v38_v15, 0  ;;  %vm745_vm6 = vcmp.lt.s32.totalorder %v38_v15, 15  ;;  %v750_v33 = vstv %s670_s28 }
  0x28   :  { %v230_v34 = vstv %s677_s30  ;;  %v754_v37 = vstv %s675_s29  ;;  %v757_v38 = vstv %s681_s3  ;;  %v760_v39 = vstv %s683_s4 }
  0x29   :  { %332 = vrot.lane.b32.xlu1 %v305_v45, %s593_s17  ;;  %96 = vrot.lane.b32.xlu0 %v639_v50, %s592_s0  ;;  %v763_v40 = vmul.f32 %v185_v26, %v647_v59  ;;  %v770_v43 = vstv %s690_s5  ;;  %v773_v44 = vmul.f32 %v185_v26, %v645_v58  ;;  %v780_v47 = vmul.f32 %v230_v34, %v647_v59 }
  0x2a   :  { %v783_v48 = vstv %s698_s6  ;;  %v788_v51 = vstv %s705_s7  ;;  %v791_v52 = vmul.f32 %v230_v34, %v645_v58  ;;  %vm200_vm7 = vcmp.lt.s32.totalorder %v666_v1, 16 }
  0x2b   :  { %991 = vst [vmem:[#allocation6_spill] sm:$0xff] %v788_v51  ;;  %v799_v3 = vmul.f32 %v783_v48, %v647_v59  ;;  %v803_v4 = vmul.f32 %v783_v48, %v645_v58  ;;  %vm55_vm8 = vcmp.ge.s32.totalorder %v666_v1, 16  ;;  %vm245_vm9 = vcmp.lt.s32.totalorder %v666_v1, 112 }
  0x2d   :  { %114 = vrot.lane.b32.xlu1 %v645_v58, %s592_s0  ;;  %112 = vrot.lane.b32.xlu0 %v647_v59, %s592_s0  ;;  %992 = vst [vmem:[#allocation7_spill] sm:$0xff] %v803_v4 }
  0x31   :  { %340 = vrot.lane.b32.xlu1 %v653_v62, %s592_s0  ;;  %338 = vrot.lane.b32.xlu0 %v655_v63, %s592_s0 }
  0x35   :  { %122 = vrot.lane.b32.xlu1 %v645_v58, %s593_s17  ;;  %120 = vrot.lane.b32.xlu0 %v647_v59, %s593_s17  ;;  %v820_v58 = vmul.f32 %v655_v63, %v230_v34 }
  0x39   :  { %348 = vrot.lane.b32.xlu1 %v653_v62, %s593_s17  ;;  %346 = vrot.lane.b32.xlu0 %v655_v63, %s593_s17 }
  0x8f   :  { %v323_v18 = vpop.permute.xlu1 %322  ;;  %v707_v19 = vpop.permute.xlu0 %94 }
  0x93   :  { %v325_v35 = vpop.permute.xlu1 %324  ;;  %v104_v36 = vpop.permute.xlu0 %103 }
  0x94   :  { %v326_v41 = vsel %vm98_vm1, %v323_v18, %v325_v35  ;;  %v327_v42 = vsel %vm98_vm1, %v325_v35, %v323_v18  ;;  %v810_v18 = vmul.f32 %v655_v63, %v185_v26  ;;  %v823_v35 = vmul.f32 %v653_v62, %v230_v34 }
  0x95   :  { %v328_v45 = vsel %vm717_vm3, %v327_v42, 0.0  ;;  %v329_v46 = vsel %vm741_vm5, %v326_v41, 0.0 }
  0x96   :  { %v356_v49 = vmul.f32 %v679_v6, %v328_v45  ;;  %v357_v50 = vmul.f32 %v679_v6, %v329_v46  ;;  %v390_v53 = vmul.f32 %v685_v8, %v328_v45  ;;  %v391_v54 = vmul.f32 %v685_v8, %v329_v46 }
  0x97   :  { %v434_v55 = vmul.f32 %v687_v9, %v328_v45  ;;  %v435_v56 = vmul.f32 %v687_v9, %v329_v46  ;;  %v331_v57 = vpop.permute.xlu0 %330  ;;  %v106_v60 = vpop.permute.xlu1 %105 }
  0x98   :  { %v362_v61 = vadd.f32 %v360_v13, %v356_v49  ;;  %v363_v2 = vadd.f32 %v361_v7, %v357_v50  ;;  %v108_v10 = vsel %vm107_vm2, %v104_v36, %v106_v60  ;;  %v109_v15 = vsel %vm107_vm2, %v106_v60, %v104_v36 }
  0x99   :  { %v813_v13 = vmul.f32 %v653_v62, %v185_v26  ;;  %v110_v59 = vsel %vm721_vm4, %v108_v10, 0.0  ;;  %v111_v7 = vsel %vm745_vm6, %v109_v15, 0.0  ;;  %v396_v41 = vadd.f32 %v394_v14, %v390_v53 }
  0x9a   :  { %v397_v36 = vadd.f32 %v692_v11, %v391_v54  ;;  %v440_v42 = vadd.f32 %v438_v16, %v434_v55  ;;  %v441_v45 = vadd.f32 %v694_v12, %v435_v56  ;;  %v140_v49 = vmul.f32 %v703_v17, %v110_v59 }
  0x9b   :  { %v333_v26 = vpop.permute.xlu1 %332  ;;  %v97_v46 = vpop.permute.xlu0 %96  ;;  %v141_v50 = vmul.f32 %v703_v17, %v111_v7  ;;  %v174_v34 = vmul.f32 %v709_v20, %v110_v59  ;;  %v175_v53 = vmul.f32 %v709_v20, %v111_v7  ;;  %v219_v56 = vmul.f32 %v711_v21, %v110_v59 }
  0x9c   :  { %v334_v60 = vsel %vm107_vm2, %v331_v57, %v333_v26  ;;  %v335_v10 = vsel %vm107_vm2, %v333_v26, %v331_v57  ;;  %v99_v12 = vsel %vm98_vm1, %v707_v19, %v97_v46  ;;  %v100_v16 = vsel %vm98_vm1, %v97_v46, %v707_v19 }
  0x9d   :  { %v336_v14 = vsel %vm721_vm4, %v334_v60, 0.0  ;;  %v337_v11 = vsel %vm745_vm6, %v335_v10, 0.0  ;;  %v220_v57 = vmul.f32 %v711_v21, %v111_v7  ;;  %v101_v15 = vsel %vm717_vm3, %v100_v16, 0.0 }
  0x9e   :  { %v366_v54 = vmul.f32 %v336_v14, %v703_v17  ;;  %v367_v55 = vmul.f32 %v337_v11, %v703_v17  ;;  %v102_v26 = vsel %vm741_vm5, %v99_v12, 0.0  ;;  %v400_v0 = vmul.f32 %v336_v14, %v709_v20 }
  0x9f   :  { %v115_v60 = vpop.permute.xlu1 %114  ;;  %v113_v19 = vpop.permute.xlu0 %112  ;;  %v401_v5 = vmul.f32 %v337_v11, %v709_v20  ;;  %v444_v17 = vmul.f32 %v336_v14, %v711_v21  ;;  %v445_v59 = vmul.f32 %v337_v11, %v711_v21  ;;  %v130_v7 = vmul.f32 %v679_v6, %v101_v15 }
  0xa0   :  { %v368_v46 = vadd.f32 %v366_v54, %v362_v61  ;;  %v369_v10 = vadd.f32 %v367_v55, %v363_v2  ;;  %v131_v4 = vmul.f32 %v679_v6, %v102_v26  ;;  %v164_v16 = vmul.f32 %v685_v8, %v101_v15 }
  0xa1   :  { %v165_v12 = vmul.f32 %v685_v8, %v102_v26  ;;  %v209_v51 = vmul.f32 %v687_v9, %v101_v15  ;;  %v210_v61 = vmul.f32 %v687_v9, %v102_v26  ;;  %v136_v2 = vadd.f32 %v715_v22, %v130_v7 }
  0xa2   :  { %v137_v20 = vadd.f32 %v733_v28, %v131_v4  ;;  %v116_v14 = vsel %vm98_vm1, %v113_v19, %v115_v60  ;;  %v117_v21 = vsel %vm98_vm1, %v115_v60, %v113_v19  ;;  %v170_v54 = vadd.f32 %v726_v25, %v164_v16 }
  0xa3   :  { %v341_v11 = vpop.permute.xlu1 %340  ;;  %v339_v6 = vpop.permute.xlu0 %338  ;;  %v171_v8 = vadd.f32 %v736_v29, %v165_v12  ;;  %v215_v55 = vadd.f32 %v730_v27, %v209_v51  ;;  %v216_v9 = vadd.f32 %v739_v30, %v210_v61  ;;  %v118_v22 = vsel %vm717_vm3, %v117_v21, 0.0 }
  0xa4   :  { %v119_v28 = vsel %vm741_vm5, %v116_v14, 0.0  ;;  %v142_v4 = vadd.f32 %v140_v49, %v136_v2  ;;  %v143_v15 = vadd.f32 %v141_v50, %v137_v20  ;;  %v402_v26 = vadd.f32 %v400_v0, %v396_v41 }
  0xa5   :  { %v403_v60 = vadd.f32 %v401_v5, %v397_v36  ;;  %v146_v19 = vmul.f32 %v750_v33, %v118_v22  ;;  %v147_v25 = vmul.f32 %v750_v33, %v119_v28  ;;  %v446_v7 = vadd.f32 %v444_v17, %v440_v42 }
  0xa6   :  { %v447_v29 = vadd.f32 %v445_v59, %v441_v45  ;;  %v176_v16 = vadd.f32 %v174_v34, %v170_v54  ;;  %v177_v27 = vadd.f32 %v175_v53, %v171_v8  ;;  %v180_v21 = vmul.f32 %v754_v37, %v118_v22 }
  0xa7   :  { %v123_v51 = vpop.permute.xlu1 %122  ;;  %v121_v30 = vpop.permute.xlu0 %120  ;;  %v148_v12 = vadd.f32 %v146_v19, %v142_v4  ;;  %v879_v61 = vadd.f32 %v147_v25, %v143_v15  ;;  %v181_v49 = vmul.f32 %v754_v37, %v119_v28  ;;  %v221_v50 = vadd.f32 %v219_v56, %v215_v55 }
  0xa8   :  { %v222_v0 = vadd.f32 %v220_v57, %v216_v9  ;;  %v342_v5 = vsel %vm98_vm1, %v339_v6, %v341_v11  ;;  %v343_v41 = vsel %vm98_vm1, %v341_v11, %v339_v6  ;;  %v225_v36 = vmul.f32 %v757_v38, %v118_v22 }
  0xa9   :  { %v226_v42 = vmul.f32 %v757_v38, %v119_v28  ;;  %v344_v45 = vsel %vm717_vm3, %v343_v41, 0.0  ;;  %v345_v34 = vsel %vm741_vm5, %v342_v5, 0.0  ;;  %v124_v20 = vsel %vm107_vm2, %v121_v30, %v123_v51 }
  0xaa   :  { %v372_v53 = vmul.f32 %v344_v45, %v750_v33  ;;  %v373_v56 = vmul.f32 %v345_v34, %v750_v33  ;;  %v406_v57 = vmul.f32 %v344_v45, %v754_v37  ;;  %v407_v17 = vmul.f32 %v345_v34, %v754_v37 }
  0xab   :  { %v450_v59 = vmul.f32 %v344_v45, %v757_v38  ;;  %v451_v2 = vmul.f32 %v345_v34, %v757_v38  ;;  %v125_v23 = vsel %vm107_vm2, %v123_v51, %v121_v30  ;;  %v182_v31 = vadd.f32 %v180_v21, %v176_v16  ;;  %v349_v54 = vpop.permute.xlu1 %348  ;;  %v347_v33 = vpop.permute.xlu0 %346 }
  0xac   :  { %v183_v14 = vadd.f32 %v181_v49, %v177_v27  ;;  %v374_v11 = vadd.f32 %v372_v53, %v368_v46  ;;  %v375_v6 = vadd.f32 %v373_v56, %v369_v10  ;;  %v227_v8 = vadd.f32 %v225_v36, %v221_v50  ;;  %v994_v36 = vld [vmem:[#allocation7_spill] sm:$0xff] }
  0xad   :  { %v228_v55 = vadd.f32 %v226_v42, %v222_v0  ;;  %v126_v37 = vsel %vm721_vm4, %v124_v20, 0.0  ;;  %v127_v38 = vsel %vm745_vm6, %v125_v23, 0.0  ;;  %v408_v9 = vadd.f32 %v406_v57, %v402_v26 }
  0xae   :  { %v409_v22 = vadd.f32 %v407_v17, %v403_v60  ;;  %v192_v28 = vmul.f32 %v770_v43, %v126_v37  ;;  %v193_v4 = vmul.f32 %v770_v43, %v127_v38  ;;  %v452_v15 = vadd.f32 %v450_v59, %v446_v7 }
  0xaf   :  { %v453_v19 = vadd.f32 %v451_v2, %v447_v29  ;;  %v350_v46 = vsel %vm107_vm2, %v347_v33, %v349_v54  ;;  %v351_v10 = vsel %vm107_vm2, %v349_v54, %v347_v33  ;;  %v188_v26 = vadd.f32 %v763_v40, %v182_v31 }
  0xb0   :  { %v352_v25 = vsel %vm721_vm4, %v350_v46, 0.0  ;;  %v353_v16 = vsel %vm745_vm6, %v351_v10, 0.0  ;;  %v189_v60 = vadd.f32 %v773_v44, %v183_v14  ;;  %v378_v29 = vmul.f32 %v655_v63, %v783_v48 }
  0xb1   :  { %v418_v27 = vmul.f32 %v352_v25, %v770_v43  ;;  %v419_v7 = vmul.f32 %v353_v16, %v770_v43  ;;  %v379_v51 = vmul.f32 %v653_v62, %v783_v48  ;;  %v158_v24 = vmul.f32 %v760_v39, %v126_v37 }
  0xb2   :  { %v159_v30 = vmul.f32 %v760_v39, %v127_v38  ;;  %v194_v32 = vadd.f32 %v192_v28, %v188_v26  ;;  %v195_v21 = vadd.f32 %v193_v4, %v189_v60  ;;  %v414_v40 = vadd.f32 %v810_v18, %v408_v9 }
  0xb3   :  { %v415_v44 = vadd.f32 %v813_v13, %v409_v22  ;;  %v233_v49 = vadd.f32 %v780_v47, %v227_v8  ;;  %v234_v43 = vadd.f32 %v791_v52, %v228_v55  ;;  %v458_v63 = vadd.f32 %v820_v58, %v452_v15  ;;  %v993_v13 = vld [vmem:[#allocation6_spill] sm:$0xff] }
  0xb4   :  { %196 = vrot.lane.b32.xlu0 %v194_v32, %s594_s8  ;;  %198 = vrot.lane.b32.xlu1 %v195_v21, %s594_s8  ;;  %v459_v62 = vadd.f32 %v823_v35, %v453_v19  ;;  %v154_v48 = vadd.f32 %v799_v3, %v148_v12  ;;  %v384_v50 = vmul.f32 %v352_v25, %v760_v39 }
  0xb5   :  { %v385_v0 = vmul.f32 %v353_v16, %v760_v39  ;;  %v420_v18 = vadd.f32 %v418_v27, %v414_v40  ;;  %v421_v5 = vadd.f32 %v419_v7, %v415_v44  ;;  %v237_v41 = vmul.f32 %v993_v13, %v126_v37 }
  0xb6   :  { %v238_v47 = vmul.f32 %v993_v13, %v127_v38  ;;  %v160_v52 = vadd.f32 %v158_v24, %v154_v48  ;;  %v155_v42 = vadd.f32 %v994_v36, %v879_v61  ;;  %v380_v45 = vadd.f32 %v378_v29, %v374_v11 }
  0xb7   :  { %v381_v58 = vadd.f32 %v379_v51, %v375_v6  ;;  %v462_v34 = vmul.f32 %v352_v25, %v993_v13  ;;  %v463_v39 = vmul.f32 %v353_v16, %v993_v13  ;;  %v239_v53 = vadd.f32 %v237_v41, %v233_v49  ;;  %v995_v6 = vld [vmem:[#allocation5_spill] sm:$0xff] }
  0xb8   :  { %422 = vrot.lane.b32.xlu0 %v420_v18, %s594_s8  ;;  %424 = vrot.lane.b32.xlu1 %v421_v5, %s594_s8  ;;  %v161_v35 = vadd.f32 %v159_v30, %v155_v42  ;;  %v386_v3 = vadd.f32 %v384_v50, %v380_v45  ;;  %v240_v56 = vadd.f32 %v238_v47, %v234_v43  ;;  %vm58_vm10 = vcmp.lt.s32.totalorder %v995_v6, 240 }
  0xb9   :  { %v387_v12 = vadd.f32 %v385_v0, %v381_v58  ;;  %v464_v57 = vadd.f32 %v462_v34, %v458_v63  ;;  %v465_v17 = vadd.f32 %v463_v39, %v459_v62  ;;  %v596_v43 = vmov 1966171168  }
  0xba   :  { %v268_v63 = vunpack.c.l.s4 %v596_v43  ;;  %v996_v0 = vlaneseq }
  0xbc   :  { %241 = vrot.lane.b32.xlu0 %v239_v53, %s595_s9  ;;  %243 = vrot.lane.b32.xlu1 %v240_v56, %s595_s9  ;;  %v269_v50 = vunpack.c.0.s8 %v268_v63  ;;  %v271_v18 = vshrl.u32 %v996_v0, 7  ;;  %vm284_vm11 = vcmp.lt.s32.totalorder %v996_v0, 256 }
  0xbe   :  { %v272_v13 = vsub.s32 %v269_v50, %v271_v18 }
  0xc0   :  { %466 = vrot.lane.b32.xlu0 %v464_v57, %s595_s9  ;;  %468 = vrot.lane.b32.xlu1 %v465_v17, %s595_s9 }
 0x126   :  { %v197_v61 = vpop.permute.xlu0 %196  ;;  %v199_v59 = vpop.permute.xlu1 %198 }
 0x127   :  { %v202_v2 = vsel %vm200_vm7, %v199_v59, %v197_v61  ;;  %v201_v14 = vsel %vm200_vm7, %v197_v61, %v199_v59 }
 0x128   :  { %v203_v31 = vsel %vm55_vm8, %v202_v2, 0.0  ;;  %v206_v55 = vadd.f32 %v201_v14, %v161_v35 }
 0x129   :  { %v205_v54 = vadd.f32 %v203_v31, %v160_v52 }
 0x12a   :  { %v423_v20 = vpop.permute.xlu0 %422  ;;  %v425_v23 = vpop.permute.xlu1 %424 }
 0x12b   :  { %v427_v11 = vsel %vm200_vm7, %v425_v23, %v423_v20  ;;  %v426_v22 = vsel %vm200_vm7, %v423_v20, %v425_v23 }
 0x12c   :  { %v428_v37 = vsel %vm55_vm8, %v427_v11, 0.0  ;;  %v431_v16 = vadd.f32 %v426_v22, %v387_v12 }
 0x12d   :  { %v430_v19 = vadd.f32 %v428_v37, %v386_v3 }
 0x12e   :  { %v242_v33 = vpop.permute.xlu0 %241  ;;  %v244_v8 = vpop.permute.xlu1 %243 }
 0x12f   :  { %v246_v38 = vsel %vm245_vm9, %v242_v33, %v244_v8  ;;  %v247_v9 = vsel %vm245_vm9, %v244_v8, %v242_v33 }
 0x130   :  { %v249_v28 = vsel %vm58_vm10, %v247_v9, 0.0  ;;  %v250_v4 = vadd.f32 %v246_v38, %v205_v54 }
 0x131   :  { %v251_v15 = vadd.f32 %v249_v28, %v206_v55 }
 0x132   :  { %v530_v46 = vmul.f32 -1.442695, %v250_v4  ;;  %v467_v10 = vpop.permute.xlu0 %466  ;;  %v469_v25 = vpop.permute.xlu1 %468 }
 0x133   :  { %v531_v26 = vmul.f32 -1.442695, %v251_v15  ;;  %v470_v60 = vsel %vm245_vm9, %v467_v10, %v469_v25  ;;  %v471_v27 = vsel %vm245_vm9, %v469_v25, %v467_v10 }
 0x134   :  { %561 = vpow2.f32 %v530_v46  ;;  %v473_v7 = vsel %vm58_vm10, %v471_v27, 0.0  ;;  %v474_v29 = vadd.f32 %v470_v60, %v430_v19 }
 0x135   :  { %563 = vpow2.f32 %v531_v26  ;;  %v475_v51 = vadd.f32 %v473_v7, %v431_v16 }
 0x136   :  { %v550_v24 = vmul.f32 -1.442695, %v474_v29 }
 0x137   :  { %v551_v30 = vmul.f32 -1.442695, %v475_v51 }
 0x138   :  { %565 = vpow2.f32 %v550_v24 }
 0x139   :  { %567 = vpow2.f32 %v551_v30 }
 0x13e   :  { %v562_v32 = vpop.eup %561 }
 0x13f   :  { %v564_v21 = vpop.eup %563  ;;  %v258_v40 = vadd.f32 1.0, %v562_v32 }
 0x140   :  { %v259_v44 = vadd.f32 1.0, %v564_v21 }
 0x141   :  { %569 = vrcp.f32 %v258_v40 }
 0x142   :  { %v566_v49 = vpop.eup %565  ;;  %571 = vrcp.f32 %v259_v44 }
 0x143   :  { %v568_v1 = vpop.eup %567  ;;  %v482_v62 = vadd.f32 1.0, %v566_v49 }
 0x144   :  { %v483_v48 = vadd.f32 1.0, %v568_v1 }
 0x145   :  { %573 = vrcp.f32 %v482_v62 }
 0x146   :  { %575 = vrcp.f32 %v483_v48 }
 0x14b   :  { %v570_v5 = vpop.eup %569 }
 0x14c   :  { %v572_v41 = vpop.eup %571 }
 0x14d   :  { %v266_v47 = vcombine.low %v570_v5, %v572_v41 }
 0x14f   :  { %v574_v52 = vpop.eup %573  ;;  %v273_v36 = vrot.slane %v266_v47, %v272_v13 }
 0x150   :  { %v576_v42 = vpop.eup %575 }
 0x151   :  { %v280_v45 = vrot.slane %v273_v36, %v272_v13  ;;  %v490_v58 = vcombine.low %v574_v52, %v576_v42 }
 0x153   :  { %286 = vst.msk [vmem:[%s976_s2] sm:$0x3] %vm284_vm11, %v280_v45  ;;  %v497_v35 = vrot.slane %v490_v58, %v272_v13 }
 0x155   :  { %v504_v3 = vrot.slane %v497_v35, %v272_v13 }
 0x157   :  { %552 = vst.msk [vmem:[%s976_s2 + $0x2] sm:$0x3] %vm284_vm11, %v504_v3 }
 0x158   :  { %512 = vsyncpa [#allocation3], 1 }

</bundles_post_ra>
